<compile_context>
chip_gen: v6e
topology: v6e:2x2x1
jax: 0.10.0
libtpu: 0.0.40
codegen_flags: <defaults>
</compile_context>

<pallas_src>
import functools

import jax
import jax.numpy as jnp
from jax import lax
from jax.experimental import pallas as pl
from jax.experimental.pallas import tpu as pltpu


MATMUL_DTYPE = jnp.bfloat16   # MXU operand dtype (accumulation always f32)
ACT_DTYPE = jnp.bfloat16      # dtype carried between kernels (HBM traffic)

_TILE_BUDGET = 24 * 1024 * 1024   # double-buffered working set cap (v7x-safe)
_VMEM_LIMIT = 40 * 1024 * 1024    # scoped VMEM limit for the big linears


def _dtype_bytes(dt):
    return jnp.dtype(dt).itemsize


def _divisor_candidates(dim, prefs, align):
    """Preferred tile sizes (descending) that divide `dim`; fallback = full dim."""
    cands = [p for p in prefs if p <= dim and dim % p == 0 and p % align == 0]
    return cands if cands else [dim]


# ------------------------- tiled linear (+bias, +GELU) ----------------------

def _gelu(y):
    # exact (erf) GELU -- matches HF BertConfig hidden_act="gelu"
    return 0.5 * y * (1.0 + lax.erf(y * 0.7071067811865476))


def _linear_fullk_kernel(x_ref, w_ref, b_ref, o_ref, *, activation):
    y = jnp.dot(x_ref[...].astype(MATMUL_DTYPE), w_ref[...].astype(MATMUL_DTYPE),
                preferred_element_type=jnp.float32) + b_ref[...]
    if activation == "gelu":
        y = _gelu(y)
    o_ref[...] = y.astype(o_ref.dtype)


def _linear_acc_kernel(x_ref, w_ref, b_ref, o_ref, acc_ref, *, activation):
    @pl.when(pl.program_id(2) == 0)
    def _init():
        acc_ref[...] = jnp.zeros_like(acc_ref)

    acc_ref[...] += jnp.dot(
        x_ref[...].astype(MATMUL_DTYPE), w_ref[...].astype(MATMUL_DTYPE),
        preferred_element_type=jnp.float32)

    @pl.when(pl.program_id(2) == pl.num_programs(2) - 1)
    def _finalize():
        y = acc_ref[...] + b_ref[...]          # bias added exactly once
        if activation == "gelu":
            y = _gelu(y)
        o_ref[...] = y.astype(o_ref.dtype)


def _select_linear_tiles(m, n, k, x_b, w_b, o_b, budget=_TILE_BUDGET):
    tms = _divisor_candidates(m, (1024, 512, 256, 128, 64, 32, 16, 8), 8)
    tns = _divisor_candidates(n, (1024, 512, 256, 128), 128)
    # prefer full-K (removes acc scratch + revisit), shrink K before M/N
    tks = [k] + [c for c in (2048, 1024, 512, 256, 128) if c < k and k % c == 0]
    for tm in tms:
        for tn in tns:
            for tk in tks:
                vmem = (2 * (tm * tk * x_b + tk * tn * w_b + tm * tn * o_b)
                        + (tm * tn * 4 if tk != k else 0))
                if vmem <= budget:
                    return tm, tn, tk
    return tms[-1], tns[-1], tks[-1]


def linear(x, w, b, activation=None, out_dtype=None):
    m, k = x.shape
    k2, n = w.shape
    assert k == k2
    out_dtype = out_dtype or ACT_DTYPE
    tm, tn, tk = _select_linear_tiles(m, n, k, _dtype_bytes(x.dtype),
                                      _dtype_bytes(w.dtype),
                                      _dtype_bytes(out_dtype))
    if tk == k:
        return pl.pallas_call(
            functools.partial(_linear_fullk_kernel, activation=activation),
            out_shape=jax.ShapeDtypeStruct((m, n), out_dtype),
            grid=(m // tm, n // tn),
            in_specs=[
                pl.BlockSpec((tm, k), lambda i, j: (i, 0)),
                pl.BlockSpec((k, tn), lambda i, j: (0, j)),
                pl.BlockSpec((1, tn), lambda i, j: (0, j)),
            ],
            out_specs=pl.BlockSpec((tm, tn), lambda i, j: (i, j)),
            compiler_params=pltpu.CompilerParams(
                dimension_semantics=("parallel", "parallel"),
                vmem_limit_bytes=_VMEM_LIMIT),
        )(x, w, b.reshape(1, n))
    return pl.pallas_call(
        functools.partial(_linear_acc_kernel, activation=activation),
        out_shape=jax.ShapeDtypeStruct((m, n), out_dtype),
        grid=(m // tm, n // tn, k // tk),
        in_specs=[
            pl.BlockSpec((tm, tk), lambda i, j, kk: (i, kk)),
            pl.BlockSpec((tk, tn), lambda i, j, kk: (kk, j)),
            pl.BlockSpec((1, tn), lambda i, j, kk: (0, j)),
        ],
        out_specs=pl.BlockSpec((tm, tn), lambda i, j, kk: (i, j)),
        scratch_shapes=[pltpu.VMEM((tm, tn), jnp.float32)],
        compiler_params=pltpu.CompilerParams(
            dimension_semantics=("parallel", "parallel", "arbitrary"),
            vmem_limit_bytes=_VMEM_LIMIT),
    )(x, w, b.reshape(1, n))


# ----------------- tiled linear + residual + LayerNorm (fused) --------------

def _res_ln_store(y, r, g, bb, eps, o_ref):
    y = y + r
    mu = jnp.mean(y, axis=-1, keepdims=True)
    var = jnp.mean(jnp.square(y - mu), axis=-1, keepdims=True)
    o_ref[...] = ((y - mu) * lax.rsqrt(var + eps) * g + bb).astype(o_ref.dtype)


def _linear_res_ln_fullk_kernel(x_ref, w_ref, b_ref, r_ref, g_ref, bb_ref,
                                o_ref, *, eps):
    y = jnp.dot(x_ref[...].astype(MATMUL_DTYPE), w_ref[...].astype(MATMUL_DTYPE),
                preferred_element_type=jnp.float32) + b_ref[...]
    _res_ln_store(y, r_ref[...].astype(jnp.float32), g_ref[...], bb_ref[...],
                  eps, o_ref)


def _linear_res_ln_acc_kernel(x_ref, w_ref, b_ref, r_ref, g_ref, bb_ref,
                              o_ref, acc_ref, *, eps):
    @pl.when(pl.program_id(1) == 0)
    def _init():
        acc_ref[...] = jnp.zeros_like(acc_ref)

    acc_ref[...] += jnp.dot(
        x_ref[...].astype(MATMUL_DTYPE), w_ref[...].astype(MATMUL_DTYPE),
        preferred_element_type=jnp.float32)

    @pl.when(pl.program_id(1) == pl.num_programs(1) - 1)
    def _finalize():
        y = acc_ref[...] + b_ref[...]
        _res_ln_store(y, r_ref[...].astype(jnp.float32), g_ref[...], bb_ref[...],
                      eps, o_ref)


def _select_resln_tiles(m, k, n, x_b, w_b, r_b, o_b, budget=_TILE_BUDGET):
    tms = _divisor_candidates(m, (512, 256, 128, 64, 32, 16, 8), 8)
    tks = [k] + [c for c in (2048, 1024, 512, 256, 128) if c < k and k % c == 0]
    for tm in tms:
        for tk in tks:
            vmem = (2 * (tm * tk * x_b + tk * n * w_b + tm * n * r_b
                         + tm * n * o_b)
                    + (tm * n * 4 if tk != k else 0))
            if vmem <= budget:
                return tm, tk
    return tms[-1], tks[-1]


def linear_residual_layernorm(x, w, b, residual, gamma, beta, *, eps=1e-12,
                              out_dtype=None):
    # LayerNorm needs the full hidden dim per row, so N is not tiled
    # (N == hidden == multiple of 128 at real BERT sizes).
    m, k = x.shape
    k2, n = w.shape
    assert k == k2 and residual.shape == (m, n)
    out_dtype = out_dtype or ACT_DTYPE
    tm, tk = _select_resln_tiles(m, k, n, _dtype_bytes(x.dtype),
                                 _dtype_bytes(w.dtype),
                                 _dtype_bytes(residual.dtype),
                                 _dtype_bytes(out_dtype))
    args = (x, w, b.reshape(1, n), residual, gamma.reshape(1, n),
            beta.reshape(1, n))
    if tk == k:
        return pl.pallas_call(
            functools.partial(_linear_res_ln_fullk_kernel, eps=eps),
            out_shape=jax.ShapeDtypeStruct((m, n), out_dtype),
            grid=(m // tm,),
            in_specs=[
                pl.BlockSpec((tm, k), lambda i: (i, 0)),
                pl.BlockSpec((k, n), lambda i: (0, 0)),
                pl.BlockSpec((1, n), lambda i: (0, 0)),
                pl.BlockSpec((tm, n), lambda i: (i, 0)),
                pl.BlockSpec((1, n), lambda i: (0, 0)),
                pl.BlockSpec((1, n), lambda i: (0, 0)),
            ],
            out_specs=pl.BlockSpec((tm, n), lambda i: (i, 0)),
            compiler_params=pltpu.CompilerParams(
                dimension_semantics=("parallel",),
                vmem_limit_bytes=_VMEM_LIMIT),
        )(*args)
    return pl.pallas_call(
        functools.partial(_linear_res_ln_acc_kernel, eps=eps),
        out_shape=jax.ShapeDtypeStruct((m, n), out_dtype),
        grid=(m // tm, k // tk),
        in_specs=[
            pl.BlockSpec((tm, tk), lambda i, kk: (i, kk)),
            pl.BlockSpec((tk, n), lambda i, kk: (kk, 0)),
            pl.BlockSpec((1, n), lambda i, kk: (0, 0)),
            pl.BlockSpec((tm, n), lambda i, kk: (i, 0)),
            pl.BlockSpec((1, n), lambda i, kk: (0, 0)),
            pl.BlockSpec((1, n), lambda i, kk: (0, 0)),
        ],
        out_specs=pl.BlockSpec((tm, n), lambda i, kk: (i, 0)),
        scratch_shapes=[pltpu.VMEM((tm, n), jnp.float32)],
        compiler_params=pltpu.CompilerParams(
            dimension_semantics=("parallel", "arbitrary"),
            vmem_limit_bytes=_VMEM_LIMIT),
    )(*args)


# ------------------------------ LayerNorm ------------------------------------

def _layernorm_kernel(x_ref, g_ref, b_ref, o_ref, *, eps):
    x = x_ref[...].astype(jnp.float32)
    mu = jnp.mean(x, axis=-1, keepdims=True)
    var = jnp.mean(jnp.square(x - mu), axis=-1, keepdims=True)
    o_ref[...] = ((x - mu) * lax.rsqrt(var + eps) * g_ref[...]
                  + b_ref[...]).astype(o_ref.dtype)


def layernorm(x, g, b, eps=1e-12, out_dtype=None):
    m, h = x.shape
    out_dtype = out_dtype or ACT_DTYPE
    x_b, o_b = _dtype_bytes(x.dtype), _dtype_bytes(out_dtype)
    cands = _divisor_candidates(m, (1024, 512, 256, 128, 64, 32, 16, 8), 8)
    tm = cands[-1]
    for c in cands:
        if 2 * c * h * (x_b + o_b) <= (8 << 20):
            tm = c
            break
    return pl.pallas_call(
        functools.partial(_layernorm_kernel, eps=eps),
        out_shape=jax.ShapeDtypeStruct((m, h), out_dtype),
        grid=(m // tm,),
        in_specs=[
            pl.BlockSpec((tm, h), lambda i: (i, 0)),
            pl.BlockSpec((1, h), lambda i: (0, 0)),
            pl.BlockSpec((1, h), lambda i: (0, 0)),
        ],
        out_specs=pl.BlockSpec((tm, h), lambda i: (i, 0)),
        compiler_params=pltpu.CompilerParams(
            dimension_semantics=("parallel",)),
    )(x, g.reshape(1, h), b.reshape(1, h))


# ----------------- attention (query-tiled, per-head/pair stores) -------------

def _attn_kernel(qrow_ref, kv_ref, m_ref, o_ref, *, num_heads, dh, hidden,
                 scale, group):
    # qrow_ref: (tq, H or 3H) -- Q occupies the first H lanes in either case.
    # kv_ref:   (S, 3H) fused Q|K|V for the whole sequence of this batch elem.
    # TODO(synk): for very long sequences (S >= 1024) on v7x, tile over keys
    # with an online-softmax accumulator instead of the full (tq, S) scores.
    bias = m_ref[...].astype(jnp.float32)               # (1, S) additive mask
    for g in range(0, num_heads, group):                # static loop over heads
        ctxs = []
        for h in range(g, g + group):
            lo = h * dh
            # pre-scale q (tq*dh muls instead of tq*S on the score matrix)
            q = (qrow_ref[:, lo:lo + dh].astype(jnp.float32)
                 * scale).astype(MATMUL_DTYPE)
            k = kv_ref[:, hidden + lo:hidden + lo + dh].astype(MATMUL_DTYPE)
            v = kv_ref[:, 2 * hidden + lo:2 * hidden + lo + dh].astype(MATMUL_DTYPE)
            s = lax.dot_general(q, k, (((1,), (1,)), ((), ())),
                                preferred_element_type=jnp.float32)
            s = s + bias
            s = s - jnp.max(s, axis=-1, keepdims=True)
            p = jnp.exp(s)
            inv = pl.reciprocal(jnp.sum(p, axis=-1, keepdims=True), approx=True)
            ctx = jnp.dot(p.astype(MATMUL_DTYPE), v,
                          preferred_element_type=jnp.float32) * inv
            ctxs.append(ctx.astype(o_ref.dtype))
        blk = ctxs[0] if group == 1 else jnp.concatenate(ctxs, axis=-1)
        o_ref[:, g * dh:(g + group) * dh] = blk          # lane slice store


def mha_attention(qkv, mask_bias, *, num_heads, hidden, out_dtype=None):
    # qkv: (B, S, 3H) fused projection output; mask_bias: (B, 1, S) additive.
    b, s, three_h = qkv.shape
    assert three_h == 3 * hidden
    dh = hidden // num_heads
    scale = 1.0 / float(dh) ** 0.5
    out_dtype = out_dtype or qkv.dtype
    tq = _divisor_candidates(s, (256, 128), 8)[0]
    # only DMA the Q columns for the query tile when lane-alignment allows
    q_cols = hidden if hidden % 128 == 0 else three_h
    # pair heads into 128-lane stores when possible (avoids masked vst)
    if dh % 128 == 0 or num_heads % 2 != 0 or (2 * dh) % 128 != 0:
        group = 1
    else:
        group = 2
    return pl.pallas_call(
        functools.partial(_attn_kernel, num_heads=num_heads, dh=dh,
                          hidden=hidden, scale=scale, group=group),
        out_shape=jax.ShapeDtypeStruct((b, s, hidden), out_dtype),
        grid=(b, s // tq),
        in_specs=[
            pl.BlockSpec((None, tq, q_cols), lambda i, j: (i, j, 0)),
            pl.BlockSpec((None, s, three_h), lambda i, j: (i, 0, 0)),
            pl.BlockSpec((None, 1, s), lambda i, j: (i, 0, 0)),
        ],
        out_specs=pl.BlockSpec((None, tq, hidden), lambda i, j: (i, j, 0)),
        compiler_params=pltpu.CompilerParams(
            dimension_semantics=("parallel", "parallel")),
    )(qkv, qkv, mask_bias)


# -------------------- tiled mean-pool + MLP head (fused) ---------------------

def _pooled_head_kernel(x_ref, w1_ref, b1_ref, w2_ref, b2_ref, w3_ref, b3_ref,
                        o_ref, acc_ref, *, inv_seq):
    @pl.when(pl.program_id(1) == 0)
    def _init():
        acc_ref[...] = jnp.zeros_like(acc_ref)

    # running sum over the sequence tile (f32 accumulator)
    acc_ref[...] += jnp.sum(x_ref[...].astype(jnp.float32), axis=1)

    @pl.when(pl.program_id(1) == pl.num_programs(1) - 1)
    def _finalize():
        pooled = acc_ref[...] * inv_seq                  # (tb, H) mean
        # head matmuls are tiny -- keep them f32 for logit accuracy
        h1 = jnp.dot(pooled, w1_ref[...],
                     preferred_element_type=jnp.float32) + b1_ref[...]
        h2 = jnp.dot(h1, w2_ref[...],
                     preferred_element_type=jnp.float32) + b2_ref[...]
        o_ref[...] = (jnp.dot(h2, w3_ref[...],
                              preferred_element_type=jnp.float32)
                      + b3_ref[...]).astype(o_ref.dtype)


def pooled_head(x, head_params, *, out_dtype=jnp.float32):
    # torch.mean(sequence_output, dim=1) followed by Linear(H,128)->(128,64)->(64,C)
    # (dropouts are eval-mode identity); pooling is a tiled reduction over S.
    b, s, h = x.shape
    (w1, b1), (w2, b2), (w3, b3) = head_params
    n1, n2, c = w1.shape[1], w2.shape[1], w3.shape[1]
    x_b = _dtype_bytes(x.dtype)
    tb_c = _divisor_candidates(b, (64, 32, 16, 8), 8)
    ts_c = _divisor_candidates(s, (512, 256, 128, 64, 32, 16, 8), 8)
    tb, ts = tb_c[-1], ts_c[-1]
    found = False
    for cb in tb_c:
        for cs in ts_c:
            if 2 * cb * cs * h * x_b <= (8 << 20):
                tb, ts = cb, cs
                found = True
                break
        if found:
            break
    return pl.pallas_call(
        functools.partial(_pooled_head_kernel, inv_seq=1.0 / float(s)),
        out_shape=jax.ShapeDtypeStruct((b, c), out_dtype),
        grid=(b // tb, s // ts),
        in_specs=[
            pl.BlockSpec((tb, ts, h), lambda bi, si: (bi, si, 0)),
            pl.BlockSpec((h, n1), lambda bi, si: (0, 0)),
            pl.BlockSpec((1, n1), lambda bi, si: (0, 0)),
            pl.BlockSpec((n1, n2), lambda bi, si: (0, 0)),
            pl.BlockSpec((1, n2), lambda bi, si: (0, 0)),
            pl.BlockSpec((n2, c), lambda bi, si: (0, 0)),
            pl.BlockSpec((1, c), lambda bi, si: (0, 0)),
        ],
        out_specs=pl.BlockSpec((tb, c), lambda bi, si: (bi, 0)),
        scratch_shapes=[pltpu.VMEM((tb, h), jnp.float32)],
        compiler_params=pltpu.CompilerParams(
            dimension_semantics=("parallel", "arbitrary")),
    )(x, w1, b1.reshape(1, n1), w2, b2.reshape(1, n2), w3, b3.reshape(1, c))


# ------------------------------ parameters -----------------------------------

def init_params(key, *, vocab_size, max_pos, type_vocab, hidden, num_layers,
                intermediate, num_classes):
    def nrm(k, shape):
        return jax.random.normal(k, shape, jnp.float32) * 0.02

    keys = iter(jax.random.split(key, 16 * num_layers + 16))
    p = {
        "word_emb": nrm(next(keys), (vocab_size, hidden)),
        "pos_emb": nrm(next(keys), (max_pos, hidden)),
        "type_emb": nrm(next(keys), (type_vocab, hidden)),
        "emb_ln_g": jnp.ones((hidden,), jnp.float32),
        "emb_ln_b": jnp.zeros((hidden,), jnp.float32),
        "layers": [],
    }
    for _ in range(num_layers):
        q_w = nrm(next(keys), (hidden, hidden))
        k_w = nrm(next(keys), (hidden, hidden))
        v_w = nrm(next(keys), (hidden, hidden))
        lp = {
            # Q/K/V fused into a single (H, 3H) projection; big dense weights
            # are stored in bf16 (MXU operand dtype) to halve weight DMA.
            "qkv_w": jnp.concatenate([q_w, k_w, v_w], axis=1).astype(MATMUL_DTYPE),
            "qkv_b": jnp.zeros((3 * hidden,), jnp.float32),
            "ao_w": nrm(next(keys), (hidden, hidden)).astype(MATMUL_DTYPE),
            "ao_b": jnp.zeros((hidden,), jnp.float32),
            "ao_ln_g": jnp.ones((hidden,), jnp.float32),
            "ao_ln_b": jnp.zeros((hidden,), jnp.float32),
            "i_w": nrm(next(keys), (hidden, intermediate)).astype(MATMUL_DTYPE),
            "i_b": jnp.zeros((intermediate,), jnp.float32),
            "o_w": nrm(next(keys), (intermediate, hidden)).astype(MATMUL_DTYPE),
            "o_b": jnp.zeros((hidden,), jnp.float32),
            "o_ln_g": jnp.ones((hidden,), jnp.float32),
            "o_ln_b": jnp.zeros((hidden,), jnp.float32),
        }
        p["layers"].append(lp)
    p["head"] = [
        (nrm(next(keys), (hidden, 128)), jnp.zeros((128,), jnp.float32)),
        (nrm(next(keys), (128, 64)), jnp.zeros((64,), jnp.float32)),
        (nrm(next(keys), (64, num_classes)), jnp.zeros((num_classes,), jnp.float32)),
    ]
    return p


# ------------------------------- forward --------------------------------------

def biobert_forward(params, ids, mask=None, token_type_ids=None, *, num_heads):
    B, S = ids.shape
    H = params["word_emb"].shape[1]

    if mask is None:
        mask = jnp.ones((B, S), jnp.float32)
    if token_type_ids is None:
        token_type_ids = jnp.zeros((B, S), jnp.int32)
    # HF extended attention mask: (1 - mask) * -10000, broadcast over heads/queries
    mask_bias = ((1.0 - mask.astype(jnp.float32)) * -10000.0).reshape(B, 1, S)

    # Embedding gathers stay in plain JAX (glue); sum + LayerNorm in Pallas.
    x = (params["word_emb"][ids]
         + params["pos_emb"][jnp.arange(S)][None, :, :]
         + params["type_emb"][token_type_ids])
    xf = layernorm(x.reshape(B * S, H), params["emb_ln_g"], params["emb_ln_b"])
    # TODO(synk): dropout layers are eval-mode identity (no RNG dropout in kernel).

    for lp in params["layers"]:
        # fused QKV projection: (B*S, H) @ (H, 3H); no head transposes anywhere.
        qkv = linear(xf, lp["qkv_w"], lp["qkv_b"]).reshape(B, S, 3 * H)
        ctx = mha_attention(qkv, mask_bias, num_heads=num_heads,
                            hidden=H).reshape(B * S, H)
        # attention output projection + residual + LayerNorm, fused
        x1 = linear_residual_layernorm(ctx, lp["ao_w"], lp["ao_b"], xf,
                                       lp["ao_ln_g"], lp["ao_ln_b"])
        # FFN: intermediate (bias + exact GELU fused), output + residual + LN fused
        inter = linear(x1, lp["i_w"], lp["i_b"], activation="gelu")
        xf = linear_residual_layernorm(inter, lp["o_w"], lp["o_b"], x1,
                                       lp["o_ln_g"], lp["o_ln_b"])

    seq_out = xf.reshape(B, S, H)
    # tiled mean over seq dim + 3-layer head (dropouts = identity), one kernel.
    return pooled_head(seq_out, params["head"])


# --------------------------------- main ---------------------------------------

if __name__ == "__main__":
    # small BertConfig-like setup
    hidden_size = 32
    num_layers = 2
    num_attention_heads = 4
    num_classes = 3
    # NOTE: HF BertConfig defaults intermediate_size=3072; use 4*hidden for a
    # small synthetic model.
    intermediate = 4 * hidden_size
    vocab_size = 128
    max_pos = 512
    type_vocab = 2

    batch, seq = 2, 8

    root = jax.random.PRNGKey(0)
    k_param, k_ids = jax.random.split(root)
    params = init_params(
        k_param, vocab_size=vocab_size, max_pos=max_pos, type_vocab=type_vocab,
        hidden=hidden_size, num_layers=num_layers, intermediate=intermediate,
        num_classes=num_classes)

    ids = jax.random.randint(k_ids, (batch, seq), 0, vocab_size, dtype=jnp.int32)
    mask = jnp.ones((batch, seq), jnp.float32)
    token_type_ids = jnp.zeros((batch, seq), jnp.int32)

    out = biobert_forward(params, ids, mask, token_type_ids,
                          num_heads=num_attention_heads)
    out = jax.block_until_ready(out)
    assert out.shape == (batch, num_classes) and out.dtype == jnp.float32
    assert bool(jnp.all(jnp.isfinite(out)))
    print("KERNEL_OK")
</pallas_src>

<mosaic_0001>
module attributes {stable_mosaic.version = 11 : i64} {
  func.func @_layernorm_kernel(%arg0: i32, %arg1: memref<16x32xf32, #tpu.memory_space<vmem>>, %arg2: memref<1x32xf32, #tpu.memory_space<vmem>>, %arg3: memref<1x32xf32, #tpu.memory_space<vmem>>, %arg4: memref<16x32xbf16, #tpu.memory_space<vmem>>) attributes {dimension_semantics = [#tpu.dimension_semantics<parallel>], iteration_bounds = array<i64: 1>, scalar_prefetch = 0 : i64, scratch_operands = 0 : i64, tpu.core_type = #tpu.core_type<tc>, window_params = [{transform_indices = @transform_0, window_bounds = array<i64: 16, 32>}, {pipeline_mode = #tpu.pipeline_mode<synchronous>, transform_indices = @transform_1, window_bounds = array<i64: 1, 32>}, {pipeline_mode = #tpu.pipeline_mode<synchronous>, transform_indices = @transform_2, window_bounds = array<i64: 1, 32>}, {transform_indices = @transform_3, window_bounds = array<i64: 16, 32>}]} {
    %c0 = arith.constant 0 : index
    %c0_0 = arith.constant 0 : index
    %0 = vector.load %arg1[%c0, %c0_0] : memref<16x32xf32, #tpu.memory_space<vmem>>, vector<16x32xf32>
    %cst = arith.constant dense<0.000000e+00> : vector<16xf32>
    %1 = vector.multi_reduction <add>, %0, %cst [1] : vector<16x32xf32> to vector<16xf32>
    %2 = vector.shape_cast %1 : vector<16xf32> to vector<16x1xf32>
    %cst_1 = arith.constant 3.200000e+01 : f32
    %3 = vector.broadcast %cst_1 : f32 to vector<16x1xf32>
    %4 = arith.divf %2, %3 : vector<16x1xf32>
    %5 = vector.broadcast %4 : vector<16x1xf32> to vector<16x32xf32>
    %6 = arith.subf %0, %5 : vector<16x32xf32>
    %7 = arith.mulf %6, %6 : vector<16x32xf32>
    %cst_2 = arith.constant dense<0.000000e+00> : vector<16xf32>
    %8 = vector.multi_reduction <add>, %7, %cst_2 [1] : vector<16x32xf32> to vector<16xf32>
    %9 = vector.shape_cast %8 : vector<16xf32> to vector<16x1xf32>
    %cst_3 = arith.constant 3.200000e+01 : f32
    %10 = vector.broadcast %cst_3 : f32 to vector<16x1xf32>
    %11 = arith.divf %9, %10 : vector<16x1xf32>
    %12 = vector.broadcast %4 : vector<16x1xf32> to vector<16x32xf32>
    %13 = arith.subf %0, %12 : vector<16x32xf32>
    %cst_4 = arith.constant 9.99999996E-13 : f32
    %14 = vector.broadcast %cst_4 : f32 to vector<16x1xf32>
    %15 = arith.addf %11, %14 : vector<16x1xf32>
    %16 = math.rsqrt %15 : vector<16x1xf32>
    %17 = vector.broadcast %16 : vector<16x1xf32> to vector<16x32xf32>
    %18 = arith.mulf %13, %17 : vector<16x32xf32>
    %c0_5 = arith.constant 0 : index
    %c0_6 = arith.constant 0 : index
    %19 = vector.load %arg2[%c0_5, %c0_6] : memref<1x32xf32, #tpu.memory_space<vmem>>, vector<1x32xf32>
    %20 = vector.broadcast %19 : vector<1x32xf32> to vector<16x32xf32>
    %21 = arith.mulf %18, %20 : vector<16x32xf32>
    %c0_7 = arith.constant 0 : index
    %c0_8 = arith.constant 0 : index
    %22 = vector.load %arg3[%c0_7, %c0_8] : memref<1x32xf32, #tpu.memory_space<vmem>>, vector<1x32xf32>
    %23 = vector.broadcast %22 : vector<1x32xf32> to vector<16x32xf32>
    %24 = arith.addf %21, %23 : vector<16x32xf32>
    %25 = arith.truncf %24 : vector<16x32xf32> to vector<16x32xbf16>
    %c0_9 = arith.constant 0 : index
    %c0_10 = arith.constant 0 : index
    %26 = vector.load %arg4[%c0_9, %c0_10] : memref<16x32xbf16, #tpu.memory_space<vmem>>, vector<16x32xbf16>
    tpu.vector_store %arg4[%c0_9, %c0_10], %25 {strides = array<i32>} : memref<16x32xbf16, #tpu.memory_space<vmem>>, vector<16x32xbf16>,
    return
  }
  func.func @transform_0(%arg0: i32) -> (i32, i32) {
    %c0_i32 = arith.constant 0 : i32
    %c0_i32_0 = arith.constant 0 : i32
    return %arg0, %c0_i32 : i32, i32
  }
  func.func @transform_1(%arg0: i32) -> (i32, i32) {
    %c0_i32 = arith.constant 0 : i32
    %c0_i32_0 = arith.constant 0 : i32
    %c0_i32_1 = arith.constant 0 : i32
    return %c0_i32, %c0_i32_0 : i32, i32
  }
  func.func @transform_2(%arg0: i32) -> (i32, i32) {
    %c0_i32 = arith.constant 0 : i32
    %c0_i32_0 = arith.constant 0 : i32
    %c0_i32_1 = arith.constant 0 : i32
    return %c0_i32, %c0_i32_0 : i32, i32
  }
  func.func @transform_3(%arg0: i32) -> (i32, i32) {
    %c0_i32 = arith.constant 0 : i32
    %c0_i32_0 = arith.constant 0 : i32
    return %arg0, %c0_i32 : i32, i32
  }
}

</mosaic_0001>

<bundles_post_ra>
// kernel: tpu_custom_call.1
= control target key start
LH: loop header
LB: loop body
LE: loop exit
PB: predicated region body
PF: predicated region fallthrough
CT: control target
= control target key end

     0   :  { %8 = vsyncpa [#allocation3], 0  ;;  %s207_s0 = inlined_call_operand.hbm [shape: f32[16,32], index: 0, kind: input, shape index: {}]   ;;  %s208_s1 = inlined_call_operand.vmem [shape: f32[1,32], index: 1, kind: input, shape index: {}]   ;;  %s209_s2 = inlined_call_operand.vmem [shape: f32[1,32], index: 2, kind: input, shape index: {}]   ;;  %s210_s3 = inlined_call_operand.hbm [shape: bf16[16,32], index: 3, kind: output, shape index: {}]  }
   0x1   :  { %9 = vsyncpa [#allocation4], 0  ;;  %s165_s12 = smov [#allocation2]  }
   0x2   :  { %s15_s13 = sshll.u32 %s165_s12, 4  ;;  %s16_s13 = int_to_ptr.vmem [resolvable:$true] %s15_s13 }
   0x3   :  { %s129_s14 = scalar_lea.vmem %s16_s13, 256  ;;  %p134_p1 = scmp.lt.s32.totalorder %s16_s13, %s16_s13 }
   0x4   :  { %p130_p0 = scmp.ne.s32.totalorder %s16_s13, %s129_s14  ;;  %p135_p2 = scmp.lt.s32.totalorder %s129_s14, %s129_s14 }
   0x6   :  { %p136_p3 = por %p135_p2, %p134_p1 }
   0x8   :  { %p137_p4 = pnand %p136_p3, %p130_p0 }
   0xa   :  { %140 = shalt.err (!%p137_p4)
}
   0xb   :  { %s166_s15 = smov 128   ;;  %s167_s16 = smov 8  }
   0xc   :  { %21 = dma.hbm_to_vmem [thread:$0]  %s207_s0, 256, %s16_s13, [#allocation3], %s166_s15, %s166_s15, %s167_s16  }
   0xd   :  { %161 = dma.done.wait [#allocation3], 256  }
   0xe   :  { %162 = vsyncadd [#allocation3], 4294967040  ;;  %vm31_vm0 = vcmask 261120   ;;  %v29_v0 = vld [vmem:[#allocation2] sm:$0xff]  ;;  %v30_v1 = vld [vmem:[#allocation2 + $0x8] sm:$0xff]  ;;  %vm85_vm1 = vcmask 257024  }
   0xf   :  { %v32_v2 = vsel %vm31_vm0, %v29_v0, 0.0  ;;  %v35_v3 = vsel %vm31_vm0, %v30_v1, 0.0  ;;  %v105_v21 = vld [vmem:[%s208_s1] ss:$0 sm:$0xff]  ;;  %s168_s22 = smov [#allocation5]  }
  0x10   :  { %33 = vadd.xlane.f32.xlu0 %v32_v2  ;;  %v106_v23 = vld [vmem:[%s209_s2] ss:$0 sm:$0xff]  ;;  %s93_s23 = sshll.u32 %s168_s22, 4  ;;  %s94_s23 = int_to_ptr.vmem [resolvable:$true] %s93_s23 }
  0x11   :  { %s141_s1 = scalar_lea.vmem %s94_s23, 128  ;;  %p146_p6 = scmp.lt.s32.totalorder %s94_s23, %s94_s23 }
  0x12   :  { %p142_p5 = scmp.ne.s32.totalorder %s94_s23, %s141_s1  ;;  %p147_p7 = scmp.lt.s32.totalorder %s141_s1, %s141_s1 }
  0x14   :  { %36 = vadd.xlane.f32.xlu0 %v35_v3  ;;  %p148_p8 = por %p147_p7, %p146_p6 }
  0x16   :  { %p149_p9 = pnand %p148_p8, %p142_p5 }
  0x99   :  { %v34_v4 = vpop.xlane.xlu0 %33 }
  0x9a   :  { %v39_v5 = vmul.f32 0.03125, %v34_v4 }
  0x9c   :  { %v41_v6 = vsub.f32 %v29_v0, %v39_v5 }
  0x9d   :  { %v37_v7 = vpop.xlane.xlu0 %36 }
  0x9e   :  { %v40_v8 = vmul.f32 0.03125, %v37_v7  ;;  %v43_v9 = vmul.f32 %v41_v6, %v41_v6 }
  0xa0   :  { %v42_v10 = vsub.f32 %v30_v1, %v40_v8  ;;  %v45_v11 = vsel %vm31_vm0, %v43_v9, 0.0 }
  0xa1   :  { %46 = vadd.xlane.f32.xlu1 %v45_v11 }
  0xa2   :  { %v44_v12 = vmul.f32 %v42_v10, %v42_v10 }
  0xa4   :  { %v48_v13 = vsel %vm31_vm0, %v44_v12, 0.0 }
  0xa5   :  { %49 = vadd.xlane.f32.xlu1 %v48_v13 }
 0x12a   :  { %v47_v14 = vpop.xlane.xlu1 %46 }
 0x12b   :  { %v51_v15 = vmul.f32 0.03125, %v47_v14 }
 0x12d   :  { %v53_v16 = vadd.f32 1e-12, %v51_v15 }
 0x12e   :  { %v50_v17 = vpop.xlane.xlu1 %49 }
 0x12f   :  { %117 = vrsqrt.f32 %v53_v16  ;;  %v52_v18 = vmul.f32 0.03125, %v50_v17 }
 0x131   :  { %v54_v19 = vadd.f32 1e-12, %v52_v18 }
 0x133   :  { %119 = vrsqrt.f32 %v54_v19 }
 0x13c   :  { %v118_v20 = vpop.eup %117 }
 0x13d   :  { %v57_v22 = vmul.f32 %v118_v20, %v41_v6 }
 0x13f   :  { %v66_v24 = vmul.f32 %v105_v21, %v57_v22 }
 0x140   :  { %v120_v25 = vpop.eup %119 }
 0x141   :  { %v58_v26 = vmul.f32 %v120_v25, %v42_v10  ;;  %v75_v27 = vadd.f32 %v106_v23, %v66_v24 }
 0x143   :  { %v67_v28 = vmul.f32 %v105_v21, %v58_v26  ;;  %v109_v29 = vpack.c.bf16 %v75_v27, %v75_v27 }
 0x145   :  { %v76_v30 = vadd.f32 %v106_v23, %v67_v28  ;;  %86 = vst.msk [vmem:[#allocation5] sm:$0xf] %vm85_vm1, %v109_v29 }
 0x147   :  { %v110_v31 = vpack.c.bf16 %v76_v30, %v76_v30 }
 0x149   :  { %87 = vst.msk [vmem:[#allocation5 + $0x4] sm:$0xf] %vm85_vm1, %v110_v31 }
 0x14a   :  { %152 = shalt.err (!%p149_p9)
}
 0x14b   :  { %s169_s2 = smov 64   ;;  %s170_s24 = smov 4  }
 0x14c   :  { %99 = dma.vmem_to_hbm [thread:$0]  %s94_s23, 128, %s210_s3, [#allocation4], %s169_s2, %s169_s2, %s170_s24  }
 0x14d   :  { %163 = dma.done.wait [#allocation4], 128  }
 0x14e   :  { %164 = vsyncadd [#allocation4], 4294967168 }
 0x14f   :  { %103 = vsyncpa [#allocation3], 1 }
 0x150   :  { %104 = vsyncpa [#allocation4], 1 }

</bundles_post_ra>
